<compile_context>
chip_gen: v7x
topology: tpu7x:2x2x1
jax: 0.10.0
libtpu: 0.0.40
codegen_flags: <defaults>
</compile_context>

<pallas_src>
import functools

import jax
import jax.numpy as jnp
from jax.experimental import pallas as pl
from jax.experimental.pallas import tpu as pltpu

BN_EPS = 1e-5
LANE = 128
H1, H2 = 48, 16


def tent_mlp_kernel(x_ref, w_ref, bn_ref, o_ref, *, out_dim):
    x = x_ref[...]                       # [B, 128] f32 (lane-padded features)
    inv_b = 1.0 / x.shape[0]             # static batch size

    def bn_relu(h, gamma, beta):
        # Train-mode BN as a fused scale/shift (single elementwise pass for stats).
        mu = jnp.sum(h, axis=0, keepdims=True) * inv_b
        ms = jnp.sum(h * h, axis=0, keepdims=True) * inv_b
        var = jnp.maximum(ms - mu * mu, 0.0)
        scale = gamma * jax.lax.rsqrt(var + BN_EPS)   # padded lanes: gamma=0 -> 0
        shift = beta - mu * scale
        return jnp.maximum(h * scale + shift, 0.0)

    # ----- dense1 -> bn1 -> relu -----
    h = jnp.dot(x, w_ref[0], preferred_element_type=jnp.float32)        # [B, 128]
    h = bn_relu(h, bn_ref[0:1, :], bn_ref[1:2, :])
    # ----- dense2 -> bn2 -> relu -----
    h = jnp.dot(h, w_ref[1], preferred_element_type=jnp.float32)        # [B, 128]
    h = bn_relu(h, bn_ref[2:3, :], bn_ref[3:4, :])
    # ----- dense3 -> softmax over the first out_dim lanes -----
    logits = jnp.dot(h, w_ref[2], preferred_element_type=jnp.float32)   # [B, 128]

    lane = jax.lax.broadcasted_iota(jnp.int32, logits.shape, 1)
    valid = lane < out_dim
    logits = jnp.where(valid, logits, jnp.float32(-1e30))
    m = jnp.max(logits, axis=1, keepdims=True)
    e = jnp.where(valid, jnp.exp(logits - m), 0.0)
    denom = jnp.sum(e, axis=1, keepdims=True)
    # Exact divide (denom >= 1 always, since the max lane contributes exp(0)=1).
    o_ref[...] = (e / denom).astype(o_ref.dtype)


def _pad_to(a, target, axis):
    pad = target - a.shape[axis]
    if pad == 0:
        return a
    widths = [(0, 0)] * a.ndim
    widths[axis] = (0, pad)
    return jnp.pad(a, widths)


@jax.jit
def tent_mlp_forward(x, params):
    B, F = x.shape
    out_dim = params["w3"].shape[1]
    assert F <= LANE and out_dim <= LANE, "feature/class dims must be <= 128"

    # Pack everything lane-dense: 3 kernel inputs instead of 8.
    x_p = _pad_to(x.astype(jnp.float32), LANE, 1)                         # [B, 128]
    w1 = _pad_to(_pad_to(params["w1"], LANE, 0), LANE, 1)
    w2 = _pad_to(_pad_to(params["w2"], LANE, 0), LANE, 1)
    w3 = _pad_to(_pad_to(params["w3"], LANE, 0), LANE, 1)
    w = jnp.stack([w1, w2, w3], axis=0)                                   # [3,128,128]
    bn = jnp.zeros((4, LANE), jnp.float32)                                # zero pad =>
    bn = bn.at[0, :H1].set(params["g1"])                                  # padded lanes
    bn = bn.at[1, :H1].set(params["b1"])                                  # stay 0 thru BN
    bn = bn.at[2, :H2].set(params["g2"])
    bn = bn.at[3, :H2].set(params["b2"])

    vmem = pl.BlockSpec(memory_space=pltpu.MemorySpace.VMEM)
    out_p = pl.pallas_call(
        functools.partial(tent_mlp_kernel, out_dim=out_dim),
        out_shape=jax.ShapeDtypeStruct((B, LANE), jnp.float32),
        in_specs=[vmem, vmem, vmem],
        out_specs=vmem,
    )(x_p, w, bn)
    return out_p[:, :out_dim]


def init_params(key, input_shape, output_shape):
    k1, k2, k3 = jax.random.split(key, 3)

    def linear_w(k, fan_in, fan_out):
        # PyTorch nn.Linear default init, stored transposed as [fan_in, fan_out].
        bound = 1.0 / jnp.sqrt(jnp.float32(fan_in))
        return jax.random.uniform(k, (fan_in, fan_out), jnp.float32,
                                  minval=-bound, maxval=bound)

    return {
        "w1": linear_w(k1, input_shape, H1),
        "g1": jnp.ones((H1,), jnp.float32),
        "b1": jnp.zeros((H1,), jnp.float32),
        "w2": linear_w(k2, H1, H2),
        "g2": jnp.ones((H2,), jnp.float32),
        "b2": jnp.zeros((H2,), jnp.float32),
        "w3": linear_w(k3, H2, output_shape),
    }


def reference_forward(x, params):
    # Pure-JAX reference with PyTorch train-mode BN (two-pass variance).
    def bn(h, gamma, beta):
        mu = jnp.mean(h, axis=0, keepdims=True)
        var = jnp.mean((h - mu) ** 2, axis=0, keepdims=True)
        return (h - mu) * jax.lax.rsqrt(var + BN_EPS) * gamma + beta

    h = jnp.maximum(bn(x @ params["w1"], params["g1"], params["b1"]), 0.0)
    h = jnp.maximum(bn(h @ params["w2"], params["g2"], params["b2"]), 0.0)
    return jax.nn.softmax(h @ params["w3"], axis=1)


if __name__ == "__main__":
    INPUT_SHAPE = 32   # tabular feature dimension
    OUTPUT_SHAPE = 10  # number of classes
    BATCH = 8          # multiple of 8 -> sublane-aligned batch dim

    key = jax.random.PRNGKey(0)
    kx, kp = jax.random.split(key)
    x = jax.random.normal(kx, (BATCH, INPUT_SHAPE), jnp.float32)
    params = init_params(kp, INPUT_SHAPE, OUTPUT_SHAPE)

    out = jax.block_until_ready(tent_mlp_forward(x, params))
    ref = reference_forward(x, params)

    assert out.shape == (BATCH, OUTPUT_SHAPE)
    assert bool(jnp.all(jnp.isfinite(out)))
    assert jnp.allclose(jnp.sum(out, axis=1), 1.0, atol=1e-3)
    assert jnp.allclose(out, ref, atol=1e-3, rtol=1e-3)

    print("KERNEL_OK")
</pallas_src>

<mosaic_0001>
module attributes {stable_mosaic.version = 11 : i64} {
  func.func @tent_mlp_kernel(%arg0: memref<8x128xf32, #tpu.memory_space<vmem>>, %arg1: memref<3x128x128xf32, #tpu.memory_space<vmem>>, %arg2: memref<4x128xf32, #tpu.memory_space<vmem>>, %arg3: memref<8x128xf32, #tpu.memory_space<vmem>>) attributes {dimension_semantics = [], scalar_prefetch = 0 : i64, scratch_operands = 0 : i64, tpu.core_type = #tpu.core_type<tc>} {
    %c0 = arith.constant 0 : index
    %c0_0 = arith.constant 0 : index
    %0 = vector.load %arg0[%c0, %c0_0] : memref<8x128xf32, #tpu.memory_space<vmem>>, vector<8x128xf32>
    %c0_1 = arith.constant 0 : index
    %c0_2 = arith.constant 0 : index
    %c0_3 = arith.constant 0 : index
    %1 = vector.load %arg1[%c0_1, %c0_2, %c0_3] : memref<3x128x128xf32, #tpu.memory_space<vmem>>, vector<1x128x128xf32>
    %2 = vector.shape_cast %1 : vector<1x128x128xf32> to vector<128x128xf32>
    %cst = arith.constant dense<0.000000e+00> : vector<8x128xf32>
    %3 = tpu.matmul %0, %2, %cst {dimension_numbers = #tpu.dot_dimension_numbers<[1], [0], [0], [1], [0, 0, 1, 1], [], []>} : vector<8x128xf32>, vector<128x128xf32>, vector<8x128xf32> -> vector<8x128xf32>
    %c0_4 = arith.constant 0 : index
    %c0_5 = arith.constant 0 : index
    %4 = vector.load %arg2[%c0_4, %c0_5] : memref<4x128xf32, #tpu.memory_space<vmem>>, vector<1x128xf32>
    %c1 = arith.constant 1 : index
    %c0_6 = arith.constant 0 : index
    %5 = vector.load %arg2[%c1, %c0_6] : memref<4x128xf32, #tpu.memory_space<vmem>>, vector<1x128xf32>
    %cst_7 = arith.constant dense<0.000000e+00> : vector<128xf32>
    %6 = vector.multi_reduction <add>, %3, %cst_7 [0] : vector<8x128xf32> to vector<128xf32>
    %7 = vector.shape_cast %6 : vector<128xf32> to vector<1x128xf32>
    %cst_8 = arith.constant 1.250000e-01 : f32
    %8 = vector.broadcast %cst_8 : f32 to vector<1x128xf32>
    %9 = arith.mulf %7, %8 : vector<1x128xf32>
    %10 = arith.mulf %3, %3 : vector<8x128xf32>
    %cst_9 = arith.constant dense<0.000000e+00> : vector<128xf32>
    %11 = vector.multi_reduction <add>, %10, %cst_9 [0] : vector<8x128xf32> to vector<128xf32>
    %12 = vector.shape_cast %11 : vector<128xf32> to vector<1x128xf32>
    %cst_10 = arith.constant 1.250000e-01 : f32
    %13 = vector.broadcast %cst_10 : f32 to vector<1x128xf32>
    %14 = arith.mulf %12, %13 : vector<1x128xf32>
    %15 = arith.mulf %9, %9 : vector<1x128xf32>
    %16 = arith.subf %14, %15 : vector<1x128xf32>
    %cst_11 = arith.constant 0.000000e+00 : f32
    %17 = vector.broadcast %cst_11 : f32 to vector<1x128xf32>
    %18 = arith.maximumf %16, %17 : vector<1x128xf32>
    %cst_12 = arith.constant 9.99999974E-6 : f32
    %19 = vector.broadcast %cst_12 : f32 to vector<1x128xf32>
    %20 = arith.addf %18, %19 : vector<1x128xf32>
    %21 = math.rsqrt %20 : vector<1x128xf32>
    %22 = arith.mulf %4, %21 : vector<1x128xf32>
    %23 = arith.mulf %9, %22 : vector<1x128xf32>
    %24 = arith.subf %5, %23 : vector<1x128xf32>
    %25 = vector.broadcast %22 : vector<1x128xf32> to vector<8x128xf32>
    %26 = arith.mulf %3, %25 : vector<8x128xf32>
    %27 = vector.broadcast %24 : vector<1x128xf32> to vector<8x128xf32>
    %28 = arith.addf %26, %27 : vector<8x128xf32>
    %cst_13 = arith.constant 0.000000e+00 : f32
    %29 = vector.broadcast %cst_13 : f32 to vector<8x128xf32>
    %30 = arith.maximumf %28, %29 : vector<8x128xf32>
    %c1_14 = arith.constant 1 : index
    %c0_15 = arith.constant 0 : index
    %c0_16 = arith.constant 0 : index
    %31 = vector.load %arg1[%c1_14, %c0_15, %c0_16] : memref<3x128x128xf32, #tpu.memory_space<vmem>>, vector<1x128x128xf32>
    %32 = vector.shape_cast %31 : vector<1x128x128xf32> to vector<128x128xf32>
    %cst_17 = arith.constant dense<0.000000e+00> : vector<8x128xf32>
    %33 = tpu.matmul %30, %32, %cst_17 {dimension_numbers = #tpu.dot_dimension_numbers<[1], [0], [0], [1], [0, 0, 1, 1], [], []>} : vector<8x128xf32>, vector<128x128xf32>, vector<8x128xf32> -> vector<8x128xf32>
    %c2 = arith.constant 2 : index
    %c0_18 = arith.constant 0 : index
    %34 = vector.load %arg2[%c2, %c0_18] : memref<4x128xf32, #tpu.memory_space<vmem>>, vector<1x128xf32>
    %c3 = arith.constant 3 : index
    %c0_19 = arith.constant 0 : index
    %35 = vector.load %arg2[%c3, %c0_19] : memref<4x128xf32, #tpu.memory_space<vmem>>, vector<1x128xf32>
    %cst_20 = arith.constant dense<0.000000e+00> : vector<128xf32>
    %36 = vector.multi_reduction <add>, %33, %cst_20 [0] : vector<8x128xf32> to vector<128xf32>
    %37 = vector.shape_cast %36 : vector<128xf32> to vector<1x128xf32>
    %cst_21 = arith.constant 1.250000e-01 : f32
    %38 = vector.broadcast %cst_21 : f32 to vector<1x128xf32>
    %39 = arith.mulf %37, %38 : vector<1x128xf32>
    %40 = arith.mulf %33, %33 : vector<8x128xf32>
    %cst_22 = arith.constant dense<0.000000e+00> : vector<128xf32>
    %41 = vector.multi_reduction <add>, %40, %cst_22 [0] : vector<8x128xf32> to vector<128xf32>
    %42 = vector.shape_cast %41 : vector<128xf32> to vector<1x128xf32>
    %cst_23 = arith.constant 1.250000e-01 : f32
    %43 = vector.broadcast %cst_23 : f32 to vector<1x128xf32>
    %44 = arith.mulf %42, %43 : vector<1x128xf32>
    %45 = arith.mulf %39, %39 : vector<1x128xf32>
    %46 = arith.subf %44, %45 : vector<1x128xf32>
    %cst_24 = arith.constant 0.000000e+00 : f32
    %47 = vector.broadcast %cst_24 : f32 to vector<1x128xf32>
    %48 = arith.maximumf %46, %47 : vector<1x128xf32>
    %cst_25 = arith.constant 9.99999974E-6 : f32
    %49 = vector.broadcast %cst_25 : f32 to vector<1x128xf32>
    %50 = arith.addf %48, %49 : vector<1x128xf32>
    %51 = math.rsqrt %50 : vector<1x128xf32>
    %52 = arith.mulf %34, %51 : vector<1x128xf32>
    %53 = arith.mulf %39, %52 : vector<1x128xf32>
    %54 = arith.subf %35, %53 : vector<1x128xf32>
    %55 = vector.broadcast %52 : vector<1x128xf32> to vector<8x128xf32>
    %56 = arith.mulf %33, %55 : vector<8x128xf32>
    %57 = vector.broadcast %54 : vector<1x128xf32> to vector<8x128xf32>
    %58 = arith.addf %56, %57 : vector<8x128xf32>
    %cst_26 = arith.constant 0.000000e+00 : f32
    %59 = vector.broadcast %cst_26 : f32 to vector<8x128xf32>
    %60 = arith.maximumf %58, %59 : vector<8x128xf32>
    %c2_27 = arith.constant 2 : index
    %c0_28 = arith.constant 0 : index
    %c0_29 = arith.constant 0 : index
    %61 = vector.load %arg1[%c2_27, %c0_28, %c0_29] : memref<3x128x128xf32, #tpu.memory_space<vmem>>, vector<1x128x128xf32>
    %62 = vector.shape_cast %61 : vector<1x128x128xf32> to vector<128x128xf32>
    %cst_30 = arith.constant dense<0.000000e+00> : vector<8x128xf32>
    %63 = tpu.matmul %60, %62, %cst_30 {dimension_numbers = #tpu.dot_dimension_numbers<[1], [0], [0], [1], [0, 0, 1, 1], [], []>} : vector<8x128xf32>, vector<128x128xf32>, vector<8x128xf32> -> vector<8x128xf32>
    %64 = tpu.iota {dimensions = array<i32: 1>} : vector<8x128xi32>
    %c10_i32 = arith.constant 10 : i32
    %65 = vector.broadcast %c10_i32 : i32 to vector<8x128xi32>
    %66 = arith.cmpi slt, %64, %65 : vector<8x128xi32>
    %cst_31 = arith.constant -1.000000e+30 : f32
    %67 = vector.broadcast %cst_31 : f32 to vector<8x128xf32>
    %68 = arith.select %66, %63, %67 : vector<8x128xi1>, vector<8x128xf32>
    %cst_32 = arith.constant dense<0xFF800000> : vector<8xf32>
    %69 = vector.multi_reduction <maximumf>, %68, %cst_32 [1] : vector<8x128xf32> to vector<8xf32>
    %70 = vector.shape_cast %69 : vector<8xf32> to vector<8x1xf32>
    %71 = vector.broadcast %70 : vector<8x1xf32> to vector<8x128xf32>
    %72 = arith.subf %68, %71 : vector<8x128xf32>
    %73 = math.exp %72 : vector<8x128xf32>
    %cst_33 = arith.constant 0.000000e+00 : f32
    %74 = vector.broadcast %cst_33 : f32 to vector<8x128xf32>
    %75 = arith.select %66, %73, %74 : vector<8x128xi1>, vector<8x128xf32>
    %cst_34 = arith.constant dense<0.000000e+00> : vector<8xf32>
    %76 = vector.multi_reduction <add>, %75, %cst_34 [1] : vector<8x128xf32> to vector<8xf32>
    %77 = vector.shape_cast %76 : vector<8xf32> to vector<8x1xf32>
    %78 = vector.broadcast %77 : vector<8x1xf32> to vector<8x128xf32>
    %79 = arith.divf %75, %78 : vector<8x128xf32>
    %c0_35 = arith.constant 0 : index
    %c0_36 = arith.constant 0 : index
    %80 = vector.load %arg3[%c0_35, %c0_36] : memref<8x128xf32, #tpu.memory_space<vmem>>, vector<8x128xf32>
    tpu.vector_store %arg3[%c0_35, %c0_36], %79 {strides = array<i32>} : memref<8x128xf32, #tpu.memory_space<vmem>>, vector<8x128xf32>,
    return
  }
}

</mosaic_0001>

<bundles_post_ra>
// kernel: tent_mlp_forward.1
= control target key start
LH: loop header
LB: loop body
LE: loop exit
PB: predicated region body
PF: predicated region fallthrough
CT: control target
= control target key end

     0   :  { %v673_v3 = vmov 0.0|0.0   ;;  %vm674_vm0 = vmmov 0   ;;  %v675_v6 = vmov 0.0   ;;  %s903_s0 = inlined_call_operand.vmem [shape: f32[8,128], index: 0, kind: input, shape index: {}]   ;;  %s904_s1 = inlined_call_operand.vmem [shape: f32[3,128,128], index: 1, kind: input, shape index: {}]   ;;  %s905_s2 = inlined_call_operand.vmem [shape: f32[4,128], index: 2, kind: input, shape index: {}]   ;;  %s906_s3 = inlined_call_operand.hbm [shape: f32[8,128], index: 3, kind: output, shape index: {}]  }
   0x1   :  { %v16_v0 = vld [vmem:[%s904_s1] sm:$0xff]  ;;  %v17_v1 = vld [vmem:[%s904_s1 + $0x8] sm:$0xff]  ;;  %v18_v2 = vld [vmem:[%s904_s1 + $0x10] sm:$0xff]  ;;  %565 = vmatprep.subr.bf16.mxu0 %v673_v3  ;;  %492 = vmatprep.mubr.msk.f32.mxu0 %vm674_vm0, %v675_v6 }
   0x2   :  { %v566_v4 = vpack.c.bf16 %v17_v1, %v16_v0  ;;  %v19_v5 = vld [vmem:[%s904_s1 + $0x18] sm:$0xff]  ;;  %589 = vmatprep.subr.bf16.mxu1 %v673_v3  ;;  %527 = vmatprep.mubr.msk.f32.mxu1 %vm674_vm0, %v675_v6  ;;  %v20_v8 = vld [vmem:[%s904_s1 + $0x20] sm:$0xff]  ;;  %v21_v9 = vld [vmem:[%s904_s1 + $0x28] sm:$0xff] }
   0x3   :  { %v569_v7 = vpack.c.bf16 %v19_v5, %v18_v2 }
   0x4   :  { %567 = vmatpush3.bf16.msra.mxu0 %v566_v4 }
   0x5   :  { %568 = vmatprep.subr.bf16.mxu0 %v673_v3 }
   0x6   :  { %8 = vsyncpa [#allocation3], 0  ;;  %v572_v10 = vpack.c.bf16 %v21_v9, %v20_v8  ;;  %v22_v11 = vld [vmem:[%s904_s1 + $0x30] sm:$0xff]  ;;  %v23_v12 = vld [vmem:[%s904_s1 + $0x38] sm:$0xff]  ;;  %v127_v9 = vlaneseq }
   0x7   :  { %v575_v13 = vpack.c.bf16 %v23_v12, %v22_v11  ;;  %v24_v14 = vld [vmem:[%s904_s1 + $0x40] sm:$0xff]  ;;  %v25_v15 = vld [vmem:[%s904_s1 + $0x48] sm:$0xff]  ;;  %v26_v17 = vld [vmem:[%s904_s1 + $0x50] sm:$0xff] }
   0x8   :  { %570 = vmatpush3.bf16.msra.mxu0 %v569_v7  ;;  %v578_v16 = vpack.c.bf16 %v25_v15, %v24_v14  ;;  %v27_v18 = vld [vmem:[%s904_s1 + $0x58] sm:$0xff]  ;;  %v28_v20 = vld [vmem:[%s904_s1 + $0x60] sm:$0xff]  ;;  %v29_v21 = vld [vmem:[%s904_s1 + $0x68] sm:$0xff] }
   0x9   :  { %571 = vmatprep.subr.bf16.mxu0 %v673_v3  ;;  %v581_v19 = vpack.c.bf16 %v27_v18, %v26_v17  ;;  %v584_v22 = vpack.c.bf16 %v29_v21, %v28_v20  ;;  %v30_v23 = vld [vmem:[%s904_s1 + $0x70] sm:$0xff]  ;;  %v31_v24 = vld [vmem:[%s904_s1 + $0x78] sm:$0xff]  ;;  %v15_v26 = vld [vmem:[%s903_s0] sm:$0xff] }
   0xa   :  { %v587_v25 = vpack.c.bf16 %v31_v24, %v30_v23  ;;  %v377_v27 = vld [vmem:[%s904_s1 + $0x80] sm:$0xff]  ;;  %v378_v28 = vld [vmem:[%s904_s1 + $0x88] sm:$0xff]  ;;  %v379_v30 = vld [vmem:[%s904_s1 + $0x90] sm:$0xff] }
   0xb   :  { %v590_v29 = vpack.c.bf16 %v378_v28, %v377_v27  ;;  %v380_v31 = vld [vmem:[%s904_s1 + $0x98] sm:$0xff]  ;;  %v381_v33 = vld [vmem:[%s904_s1 + $0xa0] sm:$0xff]  ;;  %v382_v34 = vld [vmem:[%s904_s1 + $0xa8] sm:$0xff] }
   0xc   :  { %573 = vmatpush3.bf16.msra.mxu0 %v572_v10  ;;  %v593_v32 = vpack.c.bf16 %v380_v31, %v379_v30  ;;  %v596_v35 = vpack.c.bf16 %v382_v34, %v381_v33  ;;  %v383_v36 = vld [vmem:[%s904_s1 + $0xb0] sm:$0xff]  ;;  %v384_v37 = vld [vmem:[%s904_s1 + $0xb8] sm:$0xff]  ;;  %v385_v39 = vld [vmem:[%s904_s1 + $0xc0] sm:$0xff]  ;;  %v128_v10 = vshrl.u32 %v127_v9, 7 }
   0xd   :  { %574 = vmatprep.subr.bf16.mxu0 %v673_v3  ;;  %591 = vmatpush3.bf16.msra.mxu1 %v590_v29  ;;  %v599_v38 = vpack.c.bf16 %v384_v37, %v383_v36  ;;  %v386_v40 = vld [vmem:[%s904_s1 + $0xc8] sm:$0xff]  ;;  %v387_v42 = vld [vmem:[%s904_s1 + $0xd0] sm:$0xff]  ;;  %v388_v43 = vld [vmem:[%s904_s1 + $0xd8] sm:$0xff] }
   0xe   :  { %592 = vmatprep.subr.bf16.mxu1 %v673_v3  ;;  %v602_v41 = vpack.c.bf16 %v386_v40, %v385_v39  ;;  %v605_v44 = vpack.c.bf16 %v388_v43, %v387_v42  ;;  %v389_v45 = vld [vmem:[%s904_s1 + $0xe0] sm:$0xff]  ;;  %v390_v46 = vld [vmem:[%s904_s1 + $0xe8] sm:$0xff]  ;;  %v391_v48 = vld [vmem:[%s904_s1 + $0xf0] sm:$0xff]  ;;  %v820_v12 = vsub.s32 0, %v128_v10 }
   0xf   :  { %v608_v47 = vpack.c.bf16 %v390_v46, %v389_v45  ;;  %v392_v49 = vld [vmem:[%s904_s1 + $0xf8] sm:$0xff]  ;;  %v102_v11 = vld [vmem:[%s905_s2] sm:$0x1]  ;;  %v103_v15 = vld [vmem:[%s905_s2 + $0x1] sm:$0x1] }
  0x10   :  { %576 = vmatpush3.bf16.msra.mxu0 %v575_v13  ;;  %v611_v50 = vpack.c.bf16 %v392_v49, %v391_v48  ;;  %v393_v23 = vld [vmem:[%s904_s1 + $0x100] sm:$0xff]  ;;  %v394_v24 = vld [vmem:[%s904_s1 + $0x108] sm:$0xff]  ;;  %v396_v27 = vld [vmem:[%s904_s1 + $0x118] sm:$0xff] }
  0x11   :  { %577 = vmatprep.subr.bf16.mxu0 %v673_v3  ;;  %594 = vmatpush3.bf16.msra.mxu1 %v593_v32  ;;  %v397_v29 = vld [vmem:[%s904_s1 + $0x120] sm:$0xff]  ;;  %v398_v30 = vld [vmem:[%s904_s1 + $0x128] sm:$0xff]  ;;  %v399_v32 = vld [vmem:[%s904_s1 + $0x130] sm:$0xff] }
  0x12   :  { %595 = vmatprep.subr.bf16.mxu1 %v673_v3  ;;  %v620_v31 = vpack.c.bf16 %v398_v30, %v397_v29  ;;  %v400_v33 = vld [vmem:[%s904_s1 + $0x138] sm:$0xff]  ;;  %v402_v36 = vld [vmem:[%s904_s1 + $0x148] sm:$0xff] }
  0x13   :  { %v623_v34 = vpack.c.bf16 %v400_v33, %v399_v32  ;;  %v404_v39 = vld [vmem:[%s904_s1 + $0x158] sm:$0xff]  ;;  %v406_v42 = vld [vmem:[%s904_s1 + $0x168] sm:$0xff] }
  0x14   :  { %579 = vmatpush3.bf16.msra.mxu0 %v578_v16  ;;  %v408_v45 = vld [vmem:[%s904_s1 + $0x178] sm:$0xff] }
  0x15   :  { %580 = vmatprep.subr.bf16.mxu0 %v673_v3  ;;  %597 = vmatpush3.bf16.msra.mxu1 %v596_v35  ;;  %v401_v35 = vld [vmem:[%s904_s1 + $0x140] sm:$0xff] }
  0x16   :  { %598 = vmatprep.subr.bf16.mxu1 %v673_v3  ;;  %v626_v37 = vpack.c.bf16 %v402_v36, %v401_v35 }
  0x18   :  { %582 = vmatpush3.bf16.msra.mxu0 %v581_v19 }
  0x19   :  { %583 = vmatprep.subr.bf16.mxu0 %v673_v3  ;;  %600 = vmatpush3.bf16.msra.mxu1 %v599_v38  ;;  %v403_v38 = vld [vmem:[%s904_s1 + $0x150] sm:$0xff] }
  0x1a   :  { %601 = vmatprep.subr.bf16.mxu1 %v673_v3  ;;  %v629_v40 = vpack.c.bf16 %v404_v39, %v403_v38 }
  0x1c   :  { %585 = vmatpush3.bf16.msra.mxu0 %v584_v22 }
  0x1d   :  { %586 = vmatprep.subr.bf16.mxu0 %v673_v3  ;;  %603 = vmatpush3.bf16.msra.mxu1 %v602_v41  ;;  %v405_v41 = vld [vmem:[%s904_s1 + $0x160] sm:$0xff] }
  0x1e   :  { %604 = vmatprep.subr.bf16.mxu1 %v673_v3  ;;  %v632_v43 = vpack.c.bf16 %v406_v42, %v405_v41 }
  0x20   :  { %588 = vmatpush3.bf16.msra.mxu0 %v587_v25  ;;  %v614_v25 = vpack.c.bf16 %v394_v24, %v393_v23 }
  0x21   :  { %613 = vmatprep.subr.bf16.mxu0 %v673_v3  ;;  %606 = vmatpush3.bf16.msra.mxu1 %v605_v44  ;;  %v407_v44 = vld [vmem:[%s904_s1 + $0x170] sm:$0xff] }
  0x22   :  { %607 = vmatprep.subr.bf16.mxu1 %v673_v3  ;;  %v635_v46 = vpack.c.bf16 %v408_v45, %v407_v44 }
  0x23   :  { %493 = vmatmul.mubr.f32.vlgmr.msra.gmra.mrb[0].mxu0 %v15_v26  ;;  %v395_v26 = vld [vmem:[%s904_s1 + $0x110] sm:$0xff] }
  0x24   :  { %562 = vmatprep.mubr.msk.f32.mxu0 %vm674_vm0, %v675_v6  ;;  %615 = vmatpush3.bf16.msra.mxu0 %v614_v25  ;;  %v617_v28 = vpack.c.bf16 %v396_v27, %v395_v26 }
  0x25   :  { %609 = vmatpush3.bf16.msra.mxu1 %v608_v47  ;;  %616 = vmatprep.subr.bf16.mxu0 %v673_v3 }
  0x26   :  { %610 = vmatprep.subr.bf16.mxu1 %v673_v3 }
  0x28   :  { %618 = vmatpush3.bf16.msra.mxu0 %v617_v28 }
  0x29   :  { %612 = vmatpush3.bf16.msra.mxu1 %v611_v50  ;;  %619 = vmatprep.subr.bf16.mxu0 %v673_v3 }
  0x2c   :  { %621 = vmatpush3.bf16.msra.mxu0 %v620_v31 }
  0x2d   :  { %622 = vmatprep.subr.bf16.mxu0 %v673_v3 }
  0x30   :  { %624 = vmatpush3.bf16.msra.mxu0 %v623_v34 }
  0x31   :  { %625 = vmatprep.subr.bf16.mxu0 %v673_v3 }
  0x34   :  { %627 = vmatpush3.bf16.msra.mxu0 %v626_v37 }
  0x35   :  { %628 = vmatprep.subr.bf16.mxu0 %v673_v3 }
  0x38   :  { %630 = vmatpush3.bf16.msra.mxu0 %v629_v40 }
  0x39   :  { %631 = vmatprep.subr.bf16.mxu0 %v673_v3 }
  0x3c   :  { %633 = vmatpush3.bf16.msra.mxu0 %v632_v43 }
  0x3d   :  { %634 = vmatprep.subr.bf16.mxu0 %v673_v3 }
  0x40   :  { %636 = vmatpush3.bf16.msra.mxu0 %v635_v46 }
  0xf6   :  { %v98_v51 = vpop.f32.mrb[0].mxu0 }
  0xf7   :  { %v104_v52 = vrot.slane %v98_v51, 4  ;;  %v111_v53 = vmul.f32 %v98_v51, %v98_v51  ;;  %v494_v54 = vpop.f32.mrb[1].mxu0 }
  0xf9   :  { %v105_v55 = vadd.f32 %v104_v52, %v98_v51  ;;  %v112_v56 = vrot.slane %v111_v53, 4 }
  0xfb   :  { %v106_v57 = vrot.slane %v105_v55, 2  ;;  %v113_v58 = vadd.f32 %v112_v56, %v111_v53 }
  0xfd   :  { %v107_v59 = vadd.f32 %v106_v57, %v105_v55  ;;  %v114_v60 = vrot.slane %v113_v58, 2 }
  0xff   :  { %v108_v61 = vrot.slane %v107_v59, 1  ;;  %v115_v62 = vadd.f32 %v114_v60, %v113_v58 }
 0x101   :  { %v109_v63 = vadd.f32 %v108_v61, %v107_v59  ;;  %v116_v0 = vrot.slane %v115_v62, 1 }
 0x103   :  { %v110_v1 = vmul.f32 0.125, %v109_v63  ;;  %v117_v2 = vadd.f32 %v116_v0, %v115_v62 }
 0x105   :  { %v118_v4 = vmul.f32 0.125, %v117_v2  ;;  %v119_v5 = vmul.f32 %v110_v1, %v110_v1 }
 0x107   :  { %v120_v6 = vsub.f32 %v118_v4, %v119_v5  ;;  %v225_v4 = vld [vmem:[%s905_s2 + $0x2] sm:$0x1] }
 0x109   :  { %v121_v7 = vmax.f32 %v120_v6, 0.0 }
 0x10b   :  { %v122_v8 = vadd.f32 1e-05, %v121_v7  ;;  %v226_v7 = vld [vmem:[%s905_s2 + $0x3] sm:$0x1]  ;;  %s676_s2 = smov [#allocation2]  }
 0x10c   :  { %s369_s6 = sshll.u32 %s676_s2, 4  ;;  %s370_s6 = int_to_ptr.vmem [resolvable:$true] %s369_s6 }
 0x10d   :  { %641 = vrsqrt.f32 %v122_v8  ;;  %s649_s7 = scalar_lea.vmem %s370_s6, 128  ;;  %p654_p1 = scmp.lt.s32.totalorder %s370_s6, %s370_s6 }
 0x10e   :  { %p650_p0 = scmp.ne.s32.totalorder %s370_s6, %s649_s7  ;;  %p655_p2 = scmp.lt.s32.totalorder %s649_s7, %s649_s7 }
 0x110   :  { %p656_p3 = por %p655_p2, %p654_p1 }
 0x112   :  { %p657_p4 = pnand %p656_p3, %p650_p0 }
 0x117   :  { %v642_v13 = vpop.eup %641 }
 0x118   :  { %v124_v14 = vmul.f32 %v642_v13, %v102_v11 }
 0x11a   :  { %v130_v16 = vrot.slane %v124_v14, %v820_v12  ;;  %v125_v17 = vmul.f32 %v124_v14, %v110_v1 }
 0x11c   :  { %v126_v18 = vsub.f32 %v103_v15, %v125_v17  ;;  %v131_v19 = vmul.f32 %v130_v16, %v98_v51  ;;  %v349_v17 = vand.u32 127, %v127_v9 }
 0x11e   :  { %v135_v20 = vrot.slane %v126_v18, %v820_v12  ;;  %vm350_vm1 = vcmp.lt.s32.totalorder %v349_v17, 10 }
 0x120   :  { %v136_v21 = vadd.f32 %v135_v20, %v131_v19 }
 0x122   :  { %v137_v22 = vmax.f32 %v136_v21, 0.0 }
 0x124   :  { %528 = vmatmul.mubr.f32.vlgmr.msra.gmra.mrb[0].mxu1 %v137_v22 }
 0x1f7   :  { %v221_v47 = vpop.f32.mrb[0].mxu1 }
 0x1f8   :  { %v227_v48 = vrot.slane %v221_v47, 4  ;;  %v234_v49 = vmul.f32 %v221_v47, %v221_v47  ;;  %v529_v50 = vpop.f32.mrb[1].mxu1 }
 0x1fa   :  { %v228_v51 = vadd.f32 %v227_v48, %v221_v47  ;;  %v235_v52 = vrot.slane %v234_v49, 4 }
 0x1fc   :  { %v229_v53 = vrot.slane %v228_v51, 2  ;;  %v236_v54 = vadd.f32 %v235_v52, %v234_v49 }
 0x1fe   :  { %v230_v55 = vadd.f32 %v229_v53, %v228_v51  ;;  %v237_v3 = vrot.slane %v236_v54, 2 }
 0x200   :  { %v231_v56 = vrot.slane %v230_v55, 1  ;;  %v238_v57 = vadd.f32 %v237_v3, %v236_v54 }
 0x202   :  { %v232_v58 = vadd.f32 %v231_v56, %v230_v55  ;;  %v239_v59 = vrot.slane %v238_v57, 1 }
 0x204   :  { %v233_v60 = vmul.f32 0.125, %v232_v58  ;;  %v240_v61 = vadd.f32 %v239_v59, %v238_v57 }
 0x206   :  { %v241_v62 = vmul.f32 0.125, %v240_v61  ;;  %v242_v63 = vmul.f32 %v233_v60, %v233_v60 }
 0x208   :  { %v243_v0 = vsub.f32 %v241_v62, %v242_v63 }
 0x20a   :  { %v244_v1 = vmax.f32 %v243_v0, 0.0 }
 0x20c   :  { %v245_v2 = vadd.f32 1e-05, %v244_v1 }
 0x20e   :  { %643 = vrsqrt.f32 %v245_v2 }
 0x218   :  { %v644_v5 = vpop.eup %643 }
 0x219   :  { %v247_v6 = vmul.f32 %v644_v5, %v225_v4 }
 0x21b   :  { %v248_v8 = vmul.f32 %v247_v6, %v233_v60  ;;  %v253_v10 = vrot.slane %v247_v6, %v820_v12 }
 0x21d   :  { %v249_v11 = vsub.f32 %v226_v7, %v248_v8  ;;  %v254_v13 = vmul.f32 %v253_v10, %v221_v47 }
 0x21f   :  { %v258_v14 = vrot.slane %v249_v11, %v820_v12 }
 0x221   :  { %v259_v15 = vadd.f32 %v258_v14, %v254_v13 }
 0x223   :  { %v260_v16 = vmax.f32 %v259_v15, 0.0 }
 0x225   :  { %563 = vmatmul.mubr.f32.vlgmr.msra.gmra.mrb[2].mxu0 %v260_v16 }
 0x2f8   :  { %v344_v18 = vpop.f32.mrb[2].mxu0 }
 0x2f9   :  { %v564_v19 = vpop.f32.mrb[3].mxu0  ;;  %v351_v20 = vsel %vm350_vm1, %v344_v18, -1e+30 }
 0x2fa   :  { %352 = vmax.xlane.f32.xlu0 %v351_v20 }
 0x387   :  { %v353_v21 = vpop.xlane.xlu0 %352 }
 0x388   :  { %v354_v22 = vsub.f32 %v351_v20, %v353_v21 }
 0x38a   :  { %v355_v23 = vmul.f32 1.442695, %v354_v22 }
 0x38c   :  { %645 = vpow2.f32 %v355_v23 }
 0x396   :  { %v646_v24 = vpop.eup %645 }
 0x397   :  { %v357_v25 = vsel %vm350_vm1, %v646_v24, 0.0 }
 0x398   :  { %358 = vadd.xlane.f32.xlu0 %v357_v25 }
 0x425   :  { %v359_v26 = vpop.xlane.xlu0 %358 }
 0x426   :  { %647 = vrcp.f32 %v359_v26 }
 0x430   :  { %v648_v12 = vpop.eup %647 }
 0x431   :  { %v361_v27 = vmul.f32 %v648_v12, %v357_v25 }
 0x433   :  { %362 = vst [vmem:[#allocation2] sm:$0xff] %v361_v27 }
 0x434   :  { %660 = shalt.err (!%p657_p4)
}
 0x435   :  { %s661_s10 = scalar_lea.hbm %s906_s3, 128 }
 0x436   :  { %p662_p5 = scmp.ne.s32.totalorder %s906_s3, %s661_s10  ;;  %p665_p6 = scmp.lt.u32.totalorder %s661_s10, %s906_s3 }
 0x438   :  { %p667_p7 = pnand %p665_p6, %p662_p5 }
 0x43a   :  { %670 = shalt.err (!%p667_p7)
}
 0x43b   :  { %372 = dma.vmem_to_hbm [thread:$0]  %s370_s6, 128, %s906_s3, [#allocation3]  }
 0x43c   :  { %671 = dma.done.wait [#allocation3], 128  }
 0x43d   :  { %672 = vsyncadd [#allocation3], 4294967168 }
 0x43e   :  { %376 = vsyncpa [#allocation3], 1 }

</bundles_post_ra>
